<compile_context>
chip_gen: v5e
topology: v5e:2x2
jax: 0.10.0
libtpu: 0.0.40
codegen_flags: <defaults>
</compile_context>

<pallas_src>
import jax
import jax.numpy as jnp
from jax.experimental import pallas as pl
from jax.experimental.pallas import tpu as pltpu


# Dtype-native sublane multiple for the second-minor dim.
_SUBLANE = {1: 32, 2: 16, 4: 8, 8: 8}


def _round_up(a: int, b: int) -> int:
    return -(-a // b) * b


def _make_silu_kernel(compute_dtype):
    def kernel(x_ref, o_ref):
        x = x_ref[...].astype(compute_dtype)
        half = jnp.asarray(0.5, compute_dtype)
        # sigmoid via a single EUP transcendental: sigmoid(x) = 0.5*tanh(0.5x)+0.5
        sig = half * jnp.tanh(half * x) + half
        o_ref[...] = (x * sig).astype(o_ref.dtype)
    return kernel


def _silu_2d(x2, rows, cols, itemsize, compute_dtype,
             target_tile_bytes, vmem_limit_bytes):
    """Runs the SiLU kernel on a lane-dense (rows, cols) slab."""
    sub = _SUBLANE.get(itemsize, 8)

    # Rows per tile targeting ~target_tile_bytes, dtype-native sublane multiple.
    tr = max(sub, (target_tile_bytes // (cols * itemsize)) // sub * sub)

    # Megacore (v7x, 2 TCs): prefer >=4 grid steps so the "parallel" axis can
    # shard across cores — but only when each piece stays >= 1 MiB so the
    # per-step overhead remains negligible on 1-TC chips (v5e/v6e).
    cap_tr = _round_up(pl.cdiv(rows, 4), sub)
    if cap_tr * cols * itemsize >= (1 << 20):
        tr = min(tr, cap_tr)

    # Tiny inputs: a single full-extent block (block dim == array dim is always
    # a legal block shape, even when not a multiple of the sublane tile).
    if tr >= rows:
        tr = rows

    grid = (pl.cdiv(rows, tr),)   # last block may be partial; Pallas masks it.
    n_proc = rows * cols

    return pl.pallas_call(
        _make_silu_kernel(compute_dtype),
        out_shape=jax.ShapeDtypeStruct((rows, cols), x2.dtype),
        grid_spec=pltpu.PrefetchScalarGridSpec(
            num_scalar_prefetch=0,
            grid=grid,
            in_specs=[pl.BlockSpec((tr, cols), lambda i: (i, 0))],
            out_specs=pl.BlockSpec((tr, cols), lambda i: (i, 0)),
        ),
        compiler_params=pltpu.CompilerParams(
            dimension_semantics=("parallel",),
            vmem_limit_bytes=vmem_limit_bytes,
        ),
        cost_estimate=pl.CostEstimate(
            flops=4 * n_proc,
            transcendentals=n_proc,            # one tanh per element
            bytes_accessed=2 * n_proc * itemsize,
        ),
    )(x2)


def silu(
    x: jax.Array,
    *,
    target_tile_bytes: int = 8 * 1024 * 1024,
    vmem_limit_bytes: int = 48 * 1024 * 1024,
) -> jax.Array:
    """Applies SiLU (x * sigmoid(x)) elementwise via a Pallas TPU kernel."""
    orig_shape = x.shape
    n = x.size
    if n == 0:
        return x

    itemsize = jnp.dtype(x.dtype).itemsize
    # bf16 computes natively in bf16 (v6e/v7x have bf16 VPU/EUP; on v5e Mosaic
    # upcasts internally, so this stays correct). Everything else uses f32.
    compute_dtype = jnp.bfloat16 if x.dtype == jnp.bfloat16 else jnp.float32

    # Fast path: widest lane-dense column count that divides n exactly -> free
    # reshape, no pad before the kernel, no slice after it.
    cols = next((c for c in (1024, 512, 256, 128) if n % c == 0), None)
    if cols is not None:
        rows = n // cols
        out2 = _silu_2d(x.reshape(rows, cols), rows, cols, itemsize,
                        compute_dtype, target_tile_bytes, vmem_limit_bytes)
        return out2.reshape(orig_shape)

    # Ragged fallback (n not a multiple of 128 — typically small/odd shapes):
    # pad the flattened array up to whole lane-rows, run, slice the tail off.
    # silu(0) == 0, so zero padding is safe.
    cols = 1024 if n >= (1 << 20) else 128
    rows = pl.cdiv(n, cols)
    pad = rows * cols - n
    flat = jnp.pad(x.reshape(-1), (0, pad))
    out2 = _silu_2d(flat.reshape(rows, cols), rows, cols, itemsize,
                    compute_dtype, target_tile_bytes, vmem_limit_bytes)
    return out2.reshape(-1)[:n].reshape(orig_shape)


if __name__ == "__main__":
    # Small f32 input (hits the no-pad fast path: 2048 elems, cols=1024).
    x = jax.random.normal(jax.random.PRNGKey(0), (2, 4, 16, 16), dtype=jnp.float32)
    y = jax.block_until_ready(silu(x))
    y_ref = x * jax.nn.sigmoid(x)
    assert y.shape == x.shape and y.dtype == x.dtype
    assert jnp.allclose(y, y_ref, atol=2e-5, rtol=1e-5)

    # Awkward ragged shape (105 elems) -> padded fallback path.
    x2 = jax.random.normal(jax.random.PRNGKey(1), (3, 5, 7), dtype=jnp.float32)
    y2 = jax.block_until_ready(silu(x2))
    y2_ref = x2 * jax.nn.sigmoid(x2)
    assert y2.shape == x2.shape and y2.dtype == x2.dtype
    assert jnp.allclose(y2, y2_ref, atol=2e-5, rtol=1e-5)

    # bf16 input -> native bf16 compute path (single-transcendental sigmoid).
    x3 = jax.random.normal(jax.random.PRNGKey(2), (2, 8, 256),
                           dtype=jnp.float32).astype(jnp.bfloat16)
    y3 = jax.block_until_ready(silu(x3))
    x3f = x3.astype(jnp.float32)
    y3_ref = x3f * jax.nn.sigmoid(x3f)
    assert y3.shape == x3.shape and y3.dtype == jnp.bfloat16
    assert jnp.allclose(y3.astype(jnp.float32), y3_ref, atol=0.06, rtol=0.06)

    print("KERNEL_OK")
</pallas_src>

<mosaic_0001>
module attributes {stable_mosaic.version = 11 : i64} {
  func.func @kernel(%arg0: i32, %arg1: memref<2x1024xf32, #tpu.memory_space<vmem>>, %arg2: memref<2x1024xf32, #tpu.memory_space<vmem>>) attributes {dimension_semantics = [#tpu.dimension_semantics<parallel>], iteration_bounds = array<i64: 1>, scalar_prefetch = 0 : i64, scratch_operands = 0 : i64, tpu.core_type = #tpu.core_type<tc>, window_params = [{transform_indices = @transform_0, window_bounds = array<i64: 2, 1024>}, {transform_indices = @transform_1, window_bounds = array<i64: 2, 1024>}]} {
    %c0 = arith.constant 0 : index
    %c0_0 = arith.constant 0 : index
    %0 = vector.load %arg1[%c0, %c0_0] : memref<2x1024xf32, #tpu.memory_space<vmem>>, vector<2x1024xf32>
    %cst = arith.constant 5.000000e-01 : f32
    %1 = vector.broadcast %cst : f32 to vector<2x1024xf32>
    %2 = arith.mulf %1, %0 : vector<2x1024xf32>
    %3 = math.tanh %2 : vector<2x1024xf32>
    %cst_1 = arith.constant 5.000000e-01 : f32
    %4 = vector.broadcast %cst_1 : f32 to vector<2x1024xf32>
    %5 = arith.mulf %4, %3 : vector<2x1024xf32>
    %cst_2 = arith.constant 5.000000e-01 : f32
    %6 = vector.broadcast %cst_2 : f32 to vector<2x1024xf32>
    %7 = arith.addf %5, %6 : vector<2x1024xf32>
    %8 = arith.mulf %0, %7 : vector<2x1024xf32>
    %c0_3 = arith.constant 0 : index
    %c0_4 = arith.constant 0 : index
    %9 = vector.load %arg2[%c0_3, %c0_4] : memref<2x1024xf32, #tpu.memory_space<vmem>>, vector<2x1024xf32>
    tpu.vector_store %arg2[%c0_3, %c0_4], %8 {strides = array<i32>} : memref<2x1024xf32, #tpu.memory_space<vmem>>, vector<2x1024xf32>,
    return
  }
  func.func @transform_0(%arg0: i32) -> (i32, i32) {
    %c0_i32 = arith.constant 0 : i32
    %c0_i32_0 = arith.constant 0 : i32
    return %arg0, %c0_i32 : i32, i32
  }
  func.func @transform_1(%arg0: i32) -> (i32, i32) {
    %c0_i32 = arith.constant 0 : i32
    %c0_i32_0 = arith.constant 0 : i32
    return %arg0, %c0_i32 : i32, i32
  }
}

</mosaic_0001>

<bundles_post_ra>
// kernel: tpu_custom_call.1
= control target key start
LH: loop header
LB: loop body
LE: loop exit
PB: predicated region body
PF: predicated region fallthrough
CT: control target
= control target key end

     0   :  { %6 = vsyncpa [#allocation3], 0  ;;  %s130_s0 = inlined_call_operand.hbm [shape: f32[2,1024], index: 0, kind: input, shape index: {}]   ;;  %s131_s1 = inlined_call_operand.hbm [shape: f32[2,1024], index: 1, kind: output, shape index: {}]  }
   0x1   :  { %7 = vsyncpa [#allocation4], 0  ;;  %s13_s8 = sshll.u32 %s130_s0, 4  ;;  %s112_s9 = smov [#allocation2]   ;;  %s14_s8 = int_to_ptr.hbm [resolvable:$true] %s13_s8 }
   0x2   :  { %s15_s10 = sshll.u32 %s112_s9, 4  ;;  %s16_s10 = int_to_ptr.vmem [resolvable:$true] %s15_s10 }
   0x3   :  { %18 = dma.hbm_to_vmem [thread:$0]  %s14_s8, 256, %s16_s10, [#allocation3]  }
   0x4   :  { %108 = dma.done.wait [#allocation3], 256  }
   0x5   :  { %109 = vsyncadd [#allocation3], 4294967040  ;;  %v23_v0 = vld [vmem:[#allocation2] sm:$0xff]  ;;  %v24_v1 = vld [vmem:[#allocation2 + $0x8] sm:$0xff]  ;;  %s113_s11 = smov [#allocation5]   ;;  %s44_s14 = sshll.u32 %s131_s1, 4  ;;  %s45_s14 = int_to_ptr.hbm [resolvable:$true] %s44_s14 }
   0x6   :  { %v25_v2 = vmul.f32 0.5, %v23_v0  ;;  %v26_v3 = vmul.f32 0.5, %v24_v1  ;;  %s42_s0 = sshll.u32 %s113_s11, 4  ;;  %s43_s0 = int_to_ptr.vmem [resolvable:$true] %s42_s0 }
   0x8   :  { %56 = vtanh.f32 %v25_v2 }
   0x9   :  { %58 = vtanh.f32 %v26_v3 }
   0xe   :  { %v57_v4 = vpop.eup %56 }
   0xf   :  { %v59_v5 = vpop.eup %58  ;;  %v29_v6 = vmul.f32 0.5, %v57_v4 }
  0x10   :  { %v30_v7 = vmul.f32 0.5, %v59_v5 }
  0x11   :  { %v31_v8 = vadd.f32 0.5, %v29_v6 }
  0x12   :  { %v32_v9 = vadd.f32 0.5, %v30_v7 }
  0x13   :  { %v33_v10 = vmul.f32 %v31_v8, %v23_v0 }
  0x14   :  { %v34_v11 = vmul.f32 %v32_v9, %v24_v1 }
  0x15   :  { %35 = vst [vmem:[#allocation5] sm:$0xff] %v33_v10 }
  0x16   :  { %36 = vst [vmem:[#allocation5 + $0x8] sm:$0xff] %v34_v11 }
  0x17   :  { %47 = dma.vmem_to_hbm [thread:$0]  %s43_s0, 256, %s45_s14, [#allocation4]  }
  0x18   :  { %110 = dma.done.wait [#allocation4], 256  }
  0x19   :  { %111 = vsyncadd [#allocation4], 4294967040 }
  0x1a   :  { %52 = vsyncpa [#allocation3], 1 }
  0x1b   :  { %53 = vsyncpa [#allocation4], 1 }

</bundles_post_ra>
